<compile_context>
chip_gen: v6e
topology: v6e:2x2x1
jax: 0.10.0
libtpu: 0.0.40
codegen_flags: <defaults>
</compile_context>

<pallas_src>
import math
import jax
import jax.numpy as jnp
from jax.experimental import pallas as pl
from jax.experimental.pallas import tpu as pltpu


def _make_mha_kernel(batch_block, seq_len, hidden, num_heads, head_size):
    nhd = num_heads * head_size
    rows = batch_block * seq_len

    def kernel(x_ref, wqkv_ref, bqkv_ref, wo_ref, bo_ref, out_ref, qkv_ref, ctx_ref):
        # ---- Fused QKV projection: one MXU matmul over all Bt*S rows, f32 accumulation,
        # fused bias add. The softmax scale is already folded into the Q weights. ----
        x = x_ref[...].reshape(rows, hidden)                                    # bf16 (rows, H)
        qkv = jnp.dot(x, wqkv_ref[...],
                      preferred_element_type=jnp.float32) + bqkv_ref[...]       # f32 (rows, 3*nhd)
        # Stage once as bf16 in VMEM scratch; the large f32 value is not kept live across
        # the attention loop (avoids vreg spills of the whole projection).
        qkv_ref[...] = qkv.astype(jnp.bfloat16)

        # ---- Attention: loop over heads only; each head is one matmul batched over all
        # batch rows of the block (flash-attention style einsums). ----
        for h in range(num_heads):
            c0 = h * head_size
            q = qkv_ref[:, c0:c0 + head_size].reshape(batch_block, seq_len, head_size)
            k = qkv_ref[:, nhd + c0:nhd + c0 + head_size].reshape(batch_block, seq_len, head_size)
            v = qkv_ref[:, 2 * nhd + c0:2 * nhd + c0 + head_size].reshape(batch_block, seq_len, head_size)

            s = jnp.einsum('bqd,bkd->bqk', q, k,
                           preferred_element_type=jnp.float32)                  # (Bt, S, S) f32
            m = jnp.max(s, axis=-1, keepdims=True)
            e = jnp.exp(s - m)                                                  # f32 softmax
            p = e * pl.reciprocal(jnp.sum(e, axis=-1, keepdims=True), approx=True)
            ctx = jnp.einsum('bqk,bkd->bqd', p.astype(jnp.bfloat16), v,
                             preferred_element_type=jnp.float32)                # (Bt, S, d) f32
            # TODO(synk): with head_size < 128 this is a masked partial-lane store; a fully
            # head-batched formulation would allow one lane-dense (rows, nhd) write.
            ctx_ref[:, c0:c0 + head_size] = ctx.reshape(rows, head_size).astype(jnp.bfloat16)

        # ---- Output projection over all Bt*S rows at once (lane-dense output store). ----
        out = jnp.dot(ctx_ref[...], wo_ref[...],
                      preferred_element_type=jnp.float32) + bo_ref[...]         # (rows, H) f32
        out_ref[...] = out.reshape(batch_block, seq_len, hidden).astype(out_ref.dtype)

    return kernel


def multi_head_attention(x, params, num_heads, head_size, batch_block=None):
    """x: (B, S, hidden) float32. params: dict of Wq,bq,Wk,bk,Wv,bv,Wo,bo (float32)."""
    B, S, H = x.shape
    nhd = num_heads * head_size
    scale = 1.0 / math.sqrt(head_size)

    # Fold the 1/sqrt(head_size) scale into the Q projection (trace-time, free) and fuse
    # the three projection weights/biases into a single matmul operand.
    wqkv = jnp.concatenate([params["Wq"] * scale, params["Wk"], params["Wv"]], axis=1)  # (H, 3*nhd)
    bqkv = jnp.concatenate([params["bq"] * scale, params["bk"], params["bv"]]).reshape(1, 3 * nhd)
    wo = params["Wo"]                                                                   # (nhd, H)
    bo = params["bo"].reshape(1, H)

    # bf16 activations/weights for the MXU; biases stay f32 (added after f32 accumulation).
    x_bf = x.astype(jnp.bfloat16)
    wqkv = wqkv.astype(jnp.bfloat16)
    wo = wo.astype(jnp.bfloat16)
    bqkv = bqkv.astype(jnp.float32)
    bo = bo.astype(jnp.float32)

    if batch_block is None:
        # Target ~256 rows per grid step (fills the 256-wide MXU on v6e/v7x), but keep at
        # least 2 grid steps when possible so both v7x TensorCores get work.
        cap = max(1, 256 // S)
        cap = min(cap, max(1, B // 2))
        batch_block = 1
        for bb in range(min(B, cap), 0, -1):
            if B % bb == 0:
                batch_block = bb
                break
    assert B % batch_block == 0

    kernel = _make_mha_kernel(batch_block, S, H, num_heads, head_size)

    # Constant-index operands (weights/biases) — never re-fetched across grid steps.
    # TODO(synk): single-buffer these via pipeline_mode=pl.Buffered(1) to reclaim the
    #             duplicate weight footprint once that path is exercised/verified.
    full = lambda shape: pl.BlockSpec(shape, lambda i: tuple(0 for _ in shape))

    return pl.pallas_call(
        kernel,
        out_shape=jax.ShapeDtypeStruct((B, S, H), x.dtype),
        grid_spec=pltpu.PrefetchScalarGridSpec(
            num_scalar_prefetch=0,
            grid=(B // batch_block,),
            in_specs=[
                pl.BlockSpec((batch_block, S, H), lambda i: (i, 0, 0)),  # x
                full((H, 3 * nhd)), full((1, 3 * nhd)),                  # Wqkv, bqkv
                full((nhd, H)), full((1, H)),                            # Wo, bo
            ],
            out_specs=pl.BlockSpec((batch_block, S, H), lambda i: (i, 0, 0)),
            scratch_shapes=[
                pltpu.VMEM((batch_block * S, 3 * nhd), jnp.bfloat16),    # staged bf16 QKV
                pltpu.VMEM((batch_block * S, nhd), jnp.bfloat16),        # per-head contexts
            ],
        ),
        compiler_params=pltpu.CompilerParams(
            dimension_semantics=("parallel",),
            # 48 MiB: safe headroom on v7x (64 MiB/TC physical); ample for v5e/v6e.
            vmem_limit_bytes=48 * 1024 * 1024,
        ),
    )(x_bf, wqkv, bqkv, wo, bo)


def reference_mha(x, params, num_heads, head_size):
    B, S, H = x.shape
    nhd = num_heads * head_size
    q = x @ params["Wq"] + params["bq"]
    k = x @ params["Wk"] + params["bk"]
    v = x @ params["Wv"] + params["bv"]
    q = q.reshape(B, S, num_heads, head_size).transpose(0, 2, 1, 3)
    k = k.reshape(B, S, num_heads, head_size).transpose(0, 2, 1, 3)
    v = v.reshape(B, S, num_heads, head_size).transpose(0, 2, 1, 3)
    scores = jnp.einsum("bhqd,bhkd->bhqk", q, k) / math.sqrt(head_size)
    w = jax.nn.softmax(scores, axis=-1)
    ctx = jnp.einsum("bhqk,bhkd->bhqd", w, v).transpose(0, 2, 1, 3).reshape(B, S, nhd)
    return ctx @ params["Wo"] + params["bo"]


if __name__ == "__main__":
    B, S, hidden = 2, 8, 32
    num_heads, head_size = 4, 8
    nhd = num_heads * head_size

    key = jax.random.PRNGKey(0)
    keys = jax.random.split(key, 9)

    # Deterministic parameter init (nn.Linear-like uniform bounds).
    def lin_init(kw, kb, fan_in, fan_out):
        bound = 1.0 / math.sqrt(fan_in)
        w = jax.random.uniform(kw, (fan_in, fan_out), jnp.float32, -bound, bound)
        b = jax.random.uniform(kb, (fan_out,), jnp.float32, -bound, bound)
        return w, b

    Wq, bq = lin_init(keys[0], keys[1], hidden, nhd)
    Wk, bk = lin_init(keys[2], keys[3], hidden, nhd)
    Wv, bv = lin_init(keys[4], keys[5], hidden, nhd)
    Wo, bo = lin_init(keys[6], keys[7], nhd, hidden)
    params = dict(Wq=Wq, bq=bq, Wk=Wk, bk=bk, Wv=Wv, bv=bv, Wo=Wo, bo=bo)

    x = jax.random.normal(keys[8], (B, S, hidden), jnp.float32)

    out = multi_head_attention(x, params, num_heads, head_size)
    out = jax.block_until_ready(out)

    ref = reference_mha(x, params, num_heads, head_size)
    assert out.shape == (B, S, hidden)
    # bf16 MXU inputs vs fp32 reference -> loosened tolerance (documented divergence).
    err = jnp.max(jnp.abs(out - ref))
    assert jnp.allclose(out, ref, atol=5e-2, rtol=5e-2), f"mismatch vs reference, max err {err}"

    print("KERNEL_OK")
</pallas_src>

<mosaic_0001>
module attributes {stable_mosaic.version = 11 : i64} {
  func.func @kernel(%arg0: i32, %arg1: memref<1x8x32xbf16, #tpu.memory_space<vmem>>, %arg2: memref<32x96xbf16, #tpu.memory_space<vmem>>, %arg3: memref<1x96xf32, #tpu.memory_space<vmem>>, %arg4: memref<32x32xbf16, #tpu.memory_space<vmem>>, %arg5: memref<1x32xf32, #tpu.memory_space<vmem>>, %arg6: memref<1x8x32xf32, #tpu.memory_space<vmem>>, %arg7: memref<8x96xbf16, #tpu.memory_space<vmem>>, %arg8: memref<8x32xbf16, #tpu.memory_space<vmem>>) attributes {dimension_semantics = [#tpu.dimension_semantics<parallel>], iteration_bounds = array<i64: 2>, scalar_prefetch = 0 : i64, scratch_operands = 2 : i64, tpu.core_type = #tpu.core_type<tc>, window_params = [{transform_indices = @transform_0, window_bounds = array<i64: 1, 8, 32>}, {pipeline_mode = #tpu.pipeline_mode<synchronous>, transform_indices = @transform_1, window_bounds = array<i64: 32, 96>}, {pipeline_mode = #tpu.pipeline_mode<synchronous>, transform_indices = @transform_2, window_bounds = array<i64: 1, 96>}, {pipeline_mode = #tpu.pipeline_mode<synchronous>, transform_indices = @transform_3, window_bounds = array<i64: 32, 32>}, {pipeline_mode = #tpu.pipeline_mode<synchronous>, transform_indices = @transform_4, window_bounds = array<i64: 1, 32>}, {transform_indices = @transform_5, window_bounds = array<i64: 1, 8, 32>}]} {
    %c0 = arith.constant 0 : index
    %c0_0 = arith.constant 0 : index
    %c0_1 = arith.constant 0 : index
    %0 = vector.load %arg1[%c0, %c0_0, %c0_1] : memref<1x8x32xbf16, #tpu.memory_space<vmem>>, vector<1x8x32xbf16>
    %1 = vector.shape_cast %0 : vector<1x8x32xbf16> to vector<8x32xbf16>
    %c0_2 = arith.constant 0 : index
    %c0_3 = arith.constant 0 : index
    %2 = vector.load %arg2[%c0_2, %c0_3] : memref<32x96xbf16, #tpu.memory_space<vmem>>, vector<32x96xbf16>
    %cst = arith.constant dense<0.000000e+00> : vector<8x96xf32>
    %3 = tpu.matmul %1, %2, %cst {dimension_numbers = #tpu.dot_dimension_numbers<[1], [0], [0], [1], [0, 0, 1, 1], [], []>} : vector<8x32xbf16>, vector<32x96xbf16>, vector<8x96xf32> -> vector<8x96xf32>
    %c0_4 = arith.constant 0 : index
    %c0_5 = arith.constant 0 : index
    %4 = vector.load %arg3[%c0_4, %c0_5] : memref<1x96xf32, #tpu.memory_space<vmem>>, vector<1x96xf32>
    %5 = vector.broadcast %4 : vector<1x96xf32> to vector<8x96xf32>
    %6 = arith.addf %3, %5 : vector<8x96xf32>
    %7 = arith.truncf %6 : vector<8x96xf32> to vector<8x96xbf16>
    %c0_6 = arith.constant 0 : index
    %c0_7 = arith.constant 0 : index
    %8 = vector.load %arg7[%c0_6, %c0_7] : memref<8x96xbf16, #tpu.memory_space<vmem>>, vector<8x96xbf16>
    tpu.vector_store %arg7[%c0_6, %c0_7], %7 {strides = array<i32>} : memref<8x96xbf16, #tpu.memory_space<vmem>>, vector<8x96xbf16>,
    %c0_8 = arith.constant 0 : index
    %c0_9 = arith.constant 0 : index
    %9 = vector.load %arg7[%c0_8, %c0_9] : memref<8x96xbf16, #tpu.memory_space<vmem>>, vector<8x8xbf16>
    %10 = vector.shape_cast %9 : vector<8x8xbf16> to vector<1x8x8xbf16>
    %c0_10 = arith.constant 0 : index
    %c32 = arith.constant 32 : index
    %11 = vector.load %arg7[%c0_10, %c32] : memref<8x96xbf16, #tpu.memory_space<vmem>>, vector<8x8xbf16>
    %12 = vector.shape_cast %11 : vector<8x8xbf16> to vector<1x8x8xbf16>
    %c0_11 = arith.constant 0 : index
    %c64 = arith.constant 64 : index
    %13 = vector.load %arg7[%c0_11, %c64] : memref<8x96xbf16, #tpu.memory_space<vmem>>, vector<8x8xbf16>
    %14 = vector.shape_cast %13 : vector<8x8xbf16> to vector<1x8x8xbf16>
    "tpu.trace_start"() <{level = 10 : i32, message = "bqd,bkd->bqk"}> : () -> ()
    %cst_12 = arith.constant dense<0.000000e+00> : vector<1x8x8xf32>
    %15 = tpu.matmul %10, %12, %cst_12 {dimension_numbers = #tpu.dot_dimension_numbers<[2], [2], [1], [1], [0, 0, 0, 1, 1, 1], [0], [0]>} : vector<1x8x8xbf16>, vector<1x8x8xbf16>, vector<1x8x8xf32> -> vector<1x8x8xf32>
    "tpu.trace_stop"() : () -> ()
    %cst_13 = arith.constant dense<0xFF800000> : vector<1x8xf32>
    %16 = vector.multi_reduction <maximumf>, %15, %cst_13 [2] : vector<1x8x8xf32> to vector<1x8xf32>
    %17 = vector.shape_cast %16 : vector<1x8xf32> to vector<1x8x1xf32>
    %18 = vector.broadcast %17 : vector<1x8x1xf32> to vector<1x8x8xf32>
    %19 = arith.subf %15, %18 : vector<1x8x8xf32>
    %20 = math.exp %19 : vector<1x8x8xf32>
    %cst_14 = arith.constant dense<0.000000e+00> : vector<1x8xf32>
    %21 = vector.multi_reduction <add>, %20, %cst_14 [2] : vector<1x8x8xf32> to vector<1x8xf32>
    %22 = vector.shape_cast %21 : vector<1x8xf32> to vector<1x8x1xf32>
    %23 = tpu.reciprocal %22 {approx = true} : vector<1x8x1xf32> -> vector<1x8x1xf32>
    %24 = vector.broadcast %23 : vector<1x8x1xf32> to vector<1x8x8xf32>
    %25 = arith.mulf %20, %24 : vector<1x8x8xf32>
    %26 = arith.truncf %25 : vector<1x8x8xf32> to vector<1x8x8xbf16>
    "tpu.trace_start"() <{level = 10 : i32, message = "bqk,bkd->bqd"}> : () -> ()
    %cst_15 = arith.constant dense<0.000000e+00> : vector<1x8x8xf32>
    %27 = tpu.matmul %26, %14, %cst_15 {dimension_numbers = #tpu.dot_dimension_numbers<[2], [1], [1], [2], [0, 0, 0, 1, 1, 2], [0], [0]>} : vector<1x8x8xbf16>, vector<1x8x8xbf16>, vector<1x8x8xf32> -> vector<1x8x8xf32>
    "tpu.trace_stop"() : () -> ()
    %28 = vector.shape_cast %27 : vector<1x8x8xf32> to vector<8x8xf32>
    %29 = arith.truncf %28 : vector<8x8xf32> to vector<8x8xbf16>
    %c0_16 = arith.constant 0 : index
    %c0_17 = arith.constant 0 : index
    %30 = vector.load %arg8[%c0_16, %c0_17] : memref<8x32xbf16, #tpu.memory_space<vmem>>, vector<8x8xbf16>
    tpu.vector_store %arg8[%c0_16, %c0_17], %29 {strides = array<i32>} : memref<8x32xbf16, #tpu.memory_space<vmem>>, vector<8x8xbf16>,
    %c0_18 = arith.constant 0 : index
    %c8 = arith.constant 8 : index
    %31 = vector.load %arg7[%c0_18, %c8] : memref<8x96xbf16, #tpu.memory_space<vmem>>, vector<8x8xbf16>
    %32 = vector.shape_cast %31 : vector<8x8xbf16> to vector<1x8x8xbf16>
    %c0_19 = arith.constant 0 : index
    %c40 = arith.constant 40 : index
    %33 = vector.load %arg7[%c0_19, %c40] : memref<8x96xbf16, #tpu.memory_space<vmem>>, vector<8x8xbf16>
    %34 = vector.shape_cast %33 : vector<8x8xbf16> to vector<1x8x8xbf16>
    %c0_20 = arith.constant 0 : index
    %c72 = arith.constant 72 : index
    %35 = vector.load %arg7[%c0_20, %c72] : memref<8x96xbf16, #tpu.memory_space<vmem>>, vector<8x8xbf16>
    %36 = vector.shape_cast %35 : vector<8x8xbf16> to vector<1x8x8xbf16>
    "tpu.trace_start"() <{level = 10 : i32, message = "bqd,bkd->bqk"}> : () -> ()
    %cst_21 = arith.constant dense<0.000000e+00> : vector<1x8x8xf32>
    %37 = tpu.matmul %32, %34, %cst_21 {dimension_numbers = #tpu.dot_dimension_numbers<[2], [2], [1], [1], [0, 0, 0, 1, 1, 1], [0], [0]>} : vector<1x8x8xbf16>, vector<1x8x8xbf16>, vector<1x8x8xf32> -> vector<1x8x8xf32>
    "tpu.trace_stop"() : () -> ()
    %cst_22 = arith.constant dense<0xFF800000> : vector<1x8xf32>
    %38 = vector.multi_reduction <maximumf>, %37, %cst_22 [2] : vector<1x8x8xf32> to vector<1x8xf32>
    %39 = vector.shape_cast %38 : vector<1x8xf32> to vector<1x8x1xf32>
    %40 = vector.broadcast %39 : vector<1x8x1xf32> to vector<1x8x8xf32>
    %41 = arith.subf %37, %40 : vector<1x8x8xf32>
    %42 = math.exp %41 : vector<1x8x8xf32>
    %cst_23 = arith.constant dense<0.000000e+00> : vector<1x8xf32>
    %43 = vector.multi_reduction <add>, %42, %cst_23 [2] : vector<1x8x8xf32> to vector<1x8xf32>
    %44 = vector.shape_cast %43 : vector<1x8xf32> to vector<1x8x1xf32>
    %45 = tpu.reciprocal %44 {approx = true} : vector<1x8x1xf32> -> vector<1x8x1xf32>
    %46 = vector.broadcast %45 : vector<1x8x1xf32> to vector<1x8x8xf32>
    %47 = arith.mulf %42, %46 : vector<1x8x8xf32>
    %48 = arith.truncf %47 : vector<1x8x8xf32> to vector<1x8x8xbf16>
    "tpu.trace_start"() <{level = 10 : i32, message = "bqk,bkd->bqd"}> : () -> ()
    %cst_24 = arith.constant dense<0.000000e+00> : vector<1x8x8xf32>
    %49 = tpu.matmul %48, %36, %cst_24 {dimension_numbers = #tpu.dot_dimension_numbers<[2], [1], [1], [2], [0, 0, 0, 1, 1, 2], [0], [0]>} : vector<1x8x8xbf16>, vector<1x8x8xbf16>, vector<1x8x8xf32> -> vector<1x8x8xf32>
    "tpu.trace_stop"() : () -> ()
    %50 = vector.shape_cast %49 : vector<1x8x8xf32> to vector<8x8xf32>
    %51 = arith.truncf %50 : vector<8x8xf32> to vector<8x8xbf16>
    %c0_25 = arith.constant 0 : index
    %c8_26 = arith.constant 8 : index
    %52 = vector.load %arg8[%c0_25, %c8_26] : memref<8x32xbf16, #tpu.memory_space<vmem>>, vector<8x8xbf16>
    tpu.vector_store %arg8[%c0_25, %c8_26], %51 {strides = array<i32>} : memref<8x32xbf16, #tpu.memory_space<vmem>>, vector<8x8xbf16>,
    %c0_27 = arith.constant 0 : index
    %c16 = arith.constant 16 : index
    %53 = vector.load %arg7[%c0_27, %c16] : memref<8x96xbf16, #tpu.memory_space<vmem>>, vector<8x8xbf16>
    %54 = vector.shape_cast %53 : vector<8x8xbf16> to vector<1x8x8xbf16>
    %c0_28 = arith.constant 0 : index
    %c48 = arith.constant 48 : index
    %55 = vector.load %arg7[%c0_28, %c48] : memref<8x96xbf16, #tpu.memory_space<vmem>>, vector<8x8xbf16>
    %56 = vector.shape_cast %55 : vector<8x8xbf16> to vector<1x8x8xbf16>
    %c0_29 = arith.constant 0 : index
    %c80 = arith.constant 80 : index
    %57 = vector.load %arg7[%c0_29, %c80] : memref<8x96xbf16, #tpu.memory_space<vmem>>, vector<8x8xbf16>
    %58 = vector.shape_cast %57 : vector<8x8xbf16> to vector<1x8x8xbf16>
    "tpu.trace_start"() <{level = 10 : i32, message = "bqd,bkd->bqk"}> : () -> ()
    %cst_30 = arith.constant dense<0.000000e+00> : vector<1x8x8xf32>
    %59 = tpu.matmul %54, %56, %cst_30 {dimension_numbers = #tpu.dot_dimension_numbers<[2], [2], [1], [1], [0, 0, 0, 1, 1, 1], [0], [0]>} : vector<1x8x8xbf16>, vector<1x8x8xbf16>, vector<1x8x8xf32> -> vector<1x8x8xf32>
    "tpu.trace_stop"() : () -> ()
    %cst_31 = arith.constant dense<0xFF800000> : vector<1x8xf32>
    %60 = vector.multi_reduction <maximumf>, %59, %cst_31 [2] : vector<1x8x8xf32> to vector<1x8xf32>
    %61 = vector.shape_cast %60 : vector<1x8xf32> to vector<1x8x1xf32>
    %62 = vector.broadcast %61 : vector<1x8x1xf32> to vector<1x8x8xf32>
    %63 = arith.subf %59, %62 : vector<1x8x8xf32>
    %64 = math.exp %63 : vector<1x8x8xf32>
    %cst_32 = arith.constant dense<0.000000e+00> : vector<1x8xf32>
    %65 = vector.multi_reduction <add>, %64, %cst_32 [2] : vector<1x8x8xf32> to vector<1x8xf32>
    %66 = vector.shape_cast %65 : vector<1x8xf32> to vector<1x8x1xf32>
    %67 = tpu.reciprocal %66 {approx = true} : vector<1x8x1xf32> -> vector<1x8x1xf32>
    %68 = vector.broadcast %67 : vector<1x8x1xf32> to vector<1x8x8xf32>
    %69 = arith.mulf %64, %68 : vector<1x8x8xf32>
    %70 = arith.truncf %69 : vector<1x8x8xf32> to vector<1x8x8xbf16>
    "tpu.trace_start"() <{level = 10 : i32, message = "bqk,bkd->bqd"}> : () -> ()
    %cst_33 = arith.constant dense<0.000000e+00> : vector<1x8x8xf32>
    %71 = tpu.matmul %70, %58, %cst_33 {dimension_numbers = #tpu.dot_dimension_numbers<[2], [1], [1], [2], [0, 0, 0, 1, 1, 2], [0], [0]>} : vector<1x8x8xbf16>, vector<1x8x8xbf16>, vector<1x8x8xf32> -> vector<1x8x8xf32>
    "tpu.trace_stop"() : () -> ()
    %72 = vector.shape_cast %71 : vector<1x8x8xf32> to vector<8x8xf32>
    %73 = arith.truncf %72 : vector<8x8xf32> to vector<8x8xbf16>
    %c0_34 = arith.constant 0 : index
    %c16_35 = arith.constant 16 : index
    %74 = vector.load %arg8[%c0_34, %c16_35] : memref<8x32xbf16, #tpu.memory_space<vmem>>, vector<8x8xbf16>
    tpu.vector_store %arg8[%c0_34, %c16_35], %73 {strides = array<i32>} : memref<8x32xbf16, #tpu.memory_space<vmem>>, vector<8x8xbf16>,
    %c0_36 = arith.constant 0 : index
    %c24 = arith.constant 24 : index
    %75 = vector.load %arg7[%c0_36, %c24] : memref<8x96xbf16, #tpu.memory_space<vmem>>, vector<8x8xbf16>
    %76 = vector.shape_cast %75 : vector<8x8xbf16> to vector<1x8x8xbf16>
    %c0_37 = arith.constant 0 : index
    %c56 = arith.constant 56 : index
    %77 = vector.load %arg7[%c0_37, %c56] : memref<8x96xbf16, #tpu.memory_space<vmem>>, vector<8x8xbf16>
    %78 = vector.shape_cast %77 : vector<8x8xbf16> to vector<1x8x8xbf16>
    %c0_38 = arith.constant 0 : index
    %c88 = arith.constant 88 : index
    %79 = vector.load %arg7[%c0_38, %c88] : memref<8x96xbf16, #tpu.memory_space<vmem>>, vector<8x8xbf16>
    %80 = vector.shape_cast %79 : vector<8x8xbf16> to vector<1x8x8xbf16>
    "tpu.trace_start"() <{level = 10 : i32, message = "bqd,bkd->bqk"}> : () -> ()
    %cst_39 = arith.constant dense<0.000000e+00> : vector<1x8x8xf32>
    %81 = tpu.matmul %76, %78, %cst_39 {dimension_numbers = #tpu.dot_dimension_numbers<[2], [2], [1], [1], [0, 0, 0, 1, 1, 1], [0], [0]>} : vector<1x8x8xbf16>, vector<1x8x8xbf16>, vector<1x8x8xf32> -> vector<1x8x8xf32>
    "tpu.trace_stop"() : () -> ()
    %cst_40 = arith.constant dense<0xFF800000> : vector<1x8xf32>
    %82 = vector.multi_reduction <maximumf>, %81, %cst_40 [2] : vector<1x8x8xf32> to vector<1x8xf32>
    %83 = vector.shape_cast %82 : vector<1x8xf32> to vector<1x8x1xf32>
    %84 = vector.broadcast %83 : vector<1x8x1xf32> to vector<1x8x8xf32>
    %85 = arith.subf %81, %84 : vector<1x8x8xf32>
    %86 = math.exp %85 : vector<1x8x8xf32>
    %cst_41 = arith.constant dense<0.000000e+00> : vector<1x8xf32>
    %87 = vector.multi_reduction <add>, %86, %cst_41 [2] : vector<1x8x8xf32> to vector<1x8xf32>
    %88 = vector.shape_cast %87 : vector<1x8xf32> to vector<1x8x1xf32>
    %89 = tpu.reciprocal %88 {approx = true} : vector<1x8x1xf32> -> vector<1x8x1xf32>
    %90 = vector.broadcast %89 : vector<1x8x1xf32> to vector<1x8x8xf32>
    %91 = arith.mulf %86, %90 : vector<1x8x8xf32>
    %92 = arith.truncf %91 : vector<1x8x8xf32> to vector<1x8x8xbf16>
    "tpu.trace_start"() <{level = 10 : i32, message = "bqk,bkd->bqd"}> : () -> ()
    %cst_42 = arith.constant dense<0.000000e+00> : vector<1x8x8xf32>
    %93 = tpu.matmul %92, %80, %cst_42 {dimension_numbers = #tpu.dot_dimension_numbers<[2], [1], [1], [2], [0, 0, 0, 1, 1, 2], [0], [0]>} : vector<1x8x8xbf16>, vector<1x8x8xbf16>, vector<1x8x8xf32> -> vector<1x8x8xf32>
    "tpu.trace_stop"() : () -> ()
    %94 = vector.shape_cast %93 : vector<1x8x8xf32> to vector<8x8xf32>
    %95 = arith.truncf %94 : vector<8x8xf32> to vector<8x8xbf16>
    %c0_43 = arith.constant 0 : index
    %c24_44 = arith.constant 24 : index
    %96 = vector.load %arg8[%c0_43, %c24_44] : memref<8x32xbf16, #tpu.memory_space<vmem>>, vector<8x8xbf16>
    tpu.vector_store %arg8[%c0_43, %c24_44], %95 {strides = array<i32>} : memref<8x32xbf16, #tpu.memory_space<vmem>>, vector<8x8xbf16>,
    %c0_45 = arith.constant 0 : index
    %c0_46 = arith.constant 0 : index
    %97 = vector.load %arg8[%c0_45, %c0_46] : memref<8x32xbf16, #tpu.memory_space<vmem>>, vector<8x32xbf16>
    %c0_47 = arith.constant 0 : index
    %c0_48 = arith.constant 0 : index
    %98 = vector.load %arg4[%c0_47, %c0_48] : memref<32x32xbf16, #tpu.memory_space<vmem>>, vector<32x32xbf16>
    %cst_49 = arith.constant dense<0.000000e+00> : vector<8x32xf32>
    %99 = tpu.matmul %97, %98, %cst_49 {dimension_numbers = #tpu.dot_dimension_numbers<[1], [0], [0], [1], [0, 0, 1, 1], [], []>} : vector<8x32xbf16>, vector<32x32xbf16>, vector<8x32xf32> -> vector<8x32xf32>
    %c0_50 = arith.constant 0 : index
    %c0_51 = arith.constant 0 : index
    %100 = vector.load %arg5[%c0_50, %c0_51] : memref<1x32xf32, #tpu.memory_space<vmem>>, vector<1x32xf32>
    %101 = vector.broadcast %100 : vector<1x32xf32> to vector<8x32xf32>
    %102 = arith.addf %99, %101 : vector<8x32xf32>
    %103 = vector.shape_cast %102 : vector<8x32xf32> to vector<1x8x32xf32>
    %c0_52 = arith.constant 0 : index
    %c0_53 = arith.constant 0 : index
    %c0_54 = arith.constant 0 : index
    %104 = vector.load %arg6[%c0_52, %c0_53, %c0_54] : memref<1x8x32xf32, #tpu.memory_space<vmem>>, vector<1x8x32xf32>
    tpu.vector_store %arg6[%c0_52, %c0_53, %c0_54], %103 {strides = array<i32>} : memref<1x8x32xf32, #tpu.memory_space<vmem>>, vector<1x8x32xf32>,
    return
  }
  func.func @transform_0(%arg0: i32) -> (i32, i32, i32) {
    %c0_i32 = arith.constant 0 : i32
    %c0_i32_0 = arith.constant 0 : i32
    %c0_i32_1 = arith.constant 0 : i32
    return %arg0, %c0_i32, %c0_i32_0 : i32, i32, i32
  }
  func.func @transform_1(%arg0: i32) -> (i32, i32) {
    %c0_i32 = arith.constant 0 : i32
    %c0_i32_0 = arith.constant 0 : i32
    %c0_i32_1 = arith.constant 0 : i32
    return %c0_i32, %c0_i32_0 : i32, i32
  }
  func.func @transform_2(%arg0: i32) -> (i32, i32) {
    %c0_i32 = arith.constant 0 : i32
    %c0_i32_0 = arith.constant 0 : i32
    %c0_i32_1 = arith.constant 0 : i32
    return %c0_i32, %c0_i32_0 : i32, i32
  }
  func.func @transform_3(%arg0: i32) -> (i32, i32) {
    %c0_i32 = arith.constant 0 : i32
    %c0_i32_0 = arith.constant 0 : i32
    %c0_i32_1 = arith.constant 0 : i32
    return %c0_i32, %c0_i32_0 : i32, i32
  }
  func.func @transform_4(%arg0: i32) -> (i32, i32) {
    %c0_i32 = arith.constant 0 : i32
    %c0_i32_0 = arith.constant 0 : i32
    %c0_i32_1 = arith.constant 0 : i32
    return %c0_i32, %c0_i32_0 : i32, i32
  }
  func.func @transform_5(%arg0: i32) -> (i32, i32, i32) {
    %c0_i32 = arith.constant 0 : i32
    %c0_i32_0 = arith.constant 0 : i32
    %c0_i32_1 = arith.constant 0 : i32
    return %arg0, %c0_i32, %c0_i32_0 : i32, i32, i32
  }
}

</mosaic_0001>

<bundles_post_ra>
// kernel: tpu_custom_call.1
= control target key start
LH: loop header
LB: loop body
LE: loop exit
PB: predicated region body
PF: predicated region fallthrough
CT: control target
= control target key end

     0   :  { %10 = vsyncpa [#allocation5], 0  ;;  %s1699_s0 = inlined_call_operand.hbm [shape: bf16[2,8,32], index: 0, kind: input, shape index: {}]   ;;  %s1700_s1 = inlined_call_operand.hbm [shape: bf16[32,96], index: 1, kind: input, shape index: {}]   ;;  %s1701_s2 = inlined_call_operand.vmem [shape: f32[1,96], index: 2, kind: input, shape index: {}]   ;;  %s1702_s3 = inlined_call_operand.hbm [shape: bf16[32,32], index: 3, kind: input, shape index: {}]   ;;  %s1703_s4 = inlined_call_operand.vmem [shape: f32[1,32], index: 4, kind: input, shape index: {}]   ;;  %s1704_s5 = inlined_call_operand.hbm [shape: f32[2,8,32], index: 5, kind: output, shape index: {}]  }
   0x1   :  { %12 = vsyncpa [#allocation5 + $0x1], 0 }
   0x2   :  { %13 = vsyncpa [#allocation8], 0 }
   0x3   :  { %14 = vsyncpa [#allocation6], 0 }
   0x4   :  { %16 = vsyncpa [#allocation6 + $0x1], 0  ;;  %s1437_s18 = smov 0   ;;  %s1439_s19 = smov 0  }
   0x5   :  { %s1441_s20 = smov 0   ;;  %s1443_s21 = smov 0  }
   0x6 LB: > { %s1458_s22 = sadd.s32 4294967295, %s1383_s21   ;;  %s998_s23 = sadd.s32 4294967294, %s1383_s21   ;;  %s1383_s21 = sphi %s1443_s21, %s1726_s21   ;;  %s1379_s20 = sphi %s1441_s20, %s1725_s20   ;;  %s1375_s19 = sphi %s1439_s19, %s1724_s19   ;;  %s1371_s18 = sphi %s1437_s18, %s1723_s18  }
   0x7   : > { %p42_p0 = scmp.ne.s32.totalorder %s1375_s19, %s1371_s18  ;;  %p1705_p1 = scmp.eq.s32.totalorder %s1458_s22, 0 }
   0x8   : > { %p156_p3 = scmp.eq.s32.totalorder %s998_s23, 1  ;;  %p999_p5 = scmp.ge.s32.totalorder %s1383_s21, 1 }
   0x9   : > { %p1467_p4 = por %p1705_p1, %p42_p0  ;;  %p163_p7 = scmp.lt.s32.totalorder %s1383_s21, 3 }
   0xa   : > { %p1472_p6 = por %p156_p3, %p42_p0  ;;  %s1385_s27 = smov [#allocation7]  }
   0xb   : > { %s1709_s24 = scalar_select %p1467_p4, 1, 0 }
   0xc   : > { %s1710_s25 = scalar_select %p1472_p6, 1, 0 }
   0xd   : > { %p1477_p8 = pnand %p999_p5, %p163_p7  ;;  %s175_s28 = sshll.u32 %s1385_s27, 4  ;;  %s176_s28 = int_to_ptr.vmem [resolvable:$true] %s175_s28 }
   0xe   : > { %s1386_s30 = smov [#allocation9]   ;;  %s1246_s7 = scalar_lea.vmem %s176_s28, 256 }
   0xf   : > { %s1711_s26 = scalar_select %p1477_p8, 1, 0 }
  0x10   : > { %p1138_p9 = pneg %p1477_p8  ;;  %s191_s6 = sshll.u32 %s1386_s30, 4  ;;  %s192_s6 = int_to_ptr.vmem [resolvable:$true] %s191_s6 }
  0x11   : > { %p1247_p13 = scmp.ne.s32.totalorder %s176_s28, %s1246_s7  ;;  %p1254_p5 = scmp.lt.s32.totalorder %s176_s28, %s176_s28 }
  0x12   : > { %p1486_p11 = pnand %p1138_p9, %p1705_p1  ;;  %p1255_p7 = scmp.lt.s32.totalorder %s1246_s7, %s1246_s7 }
  0x14   : > { %p1237_p12 = pneg %p1486_p11  ;;  %p1256_p10 = por %p1255_p7, %p1254_p5 }
  0x16   : > { %p1249_p0 = pnand %p1247_p13, %p1237_p12 }
  0x18   : > { %p1250_p3 = pneg %p1249_p0 }
  0x1a   : > { %p1257_p9 = pnand %p1256_p10, %p1250_p3 }
  0x1c   : > { %1260 = shalt.err (!%p1257_p9)
}
  0x1d   : > { %s1387_s8 = smov 64   ;;  %s1388_s9 = smov 4  }
  0x1e   : > { %1141 = dma.hbm_to_vmem [thread:$0]  (!%p1486_p11), %s1700_s1, 256, %s176_s28, [#allocation8], %s1387_s8, %s1387_s8, %s1388_s9  }
  0x1f   : > { %s1272_s12 = scalar_lea.vmem %s192_s6, 256  ;;  %p1280_p2 = scmp.lt.s32.totalorder %s192_s6, %s192_s6 }
  0x20   : > { %p1273_p1 = scmp.ne.s32.totalorder %s192_s6, %s1272_s12  ;;  %p1281_p6 = scmp.lt.s32.totalorder %s1272_s12, %s1272_s12 }
  0x22   : > { %p1275_p13 = pnand %p1273_p1, %p1237_p12  ;;  %p1282_p5 = por %p1281_p6, %p1280_p2 }
  0x24   : > { %p1276_p0 = pneg %p1275_p13 }
  0x26   : > { %p1283_p10 = pnand %p1282_p5, %p1276_p0 }
  0x28   : > { %1286 = shalt.err (!%p1283_p10)
}
  0x29   : > { %1144 = dma.hbm_to_vmem [thread:$0]  (!%p1486_p11), %s1702_s3, 256, %s192_s6, [#allocation8], %s1387_s8, %s1387_s8, %s1388_s9  }
  0x2a   : > { %s1509_s15 = sadd.s32 1, %s1383_s21   ;;  %s29_s16 = sadd.s32 1, %s1379_s20 }
  0x2b   : > { %s26_s17 = ssub.s32 %s1383_s21, %s1509_s15  ;;  %p36_p1 = scmp.ne.s32.totalorder %s1379_s20, %s1375_s19 }
  0x2c   : > { %p27_p2 = scmp.eq.s32.totalorder %s26_s17, 0  ;;  %p37_p6 = scmp.eq.s32.totalorder %s1383_s21, 0 }
  0x2d   : > { %p1713_p12 = scmp.eq.s32.totalorder %s1458_s22, 1  ;;  %p1155_p7 = scmp.lt.s32.totalorder %s1383_s21, 2 }
  0x2e   : > { %s1525_s27 = scalar_select %p27_p2, %s1379_s20, %s29_s16  }
  0x2f   : > { %p1519_p3 = por %p1713_p12, %p36_p1  ;;  %p38_p9 = por %p37_p6, %p36_p1 }
  0x30   : > { %s208_s28 = sand.u32 1, %s1379_s20   ;;  %s1004_s30 = sshll.u32 %s1383_s21, 6 }
  0x31   : > { %s1714_s23 = scalar_select %p1519_p3, 1, 0 }
  0x32   : > { %s1003_s29 = sshll.u32 %s208_s28, 2  ;;  %s1532_s8 = scalar_lea.hbm %s1699_s0, %s1004_s30 }
  0x33   : > { %s212_s9 = scalar_lea.vmem [#allocation4], %s1003_s29  ;;  %p1534_p11 = pnand %p1155_p7, %p38_p9 }
  0x34   : > { %s219_s10 = sshll.u32 %s212_s9, 4  ;;  %s209_s12 = scalar_lea.sflag [#allocation5], %s208_s28  ;;  %s220_s10 = int_to_ptr.vmem [resolvable:$true] %s219_s10 }
  0x35   : > { %s1287_s13 = scalar_lea.hbm %s1532_s8, 64  ;;  %p1289_p0 = pneg %p1534_p11 }
  0x36   : > { %p1288_p13 = scmp.ne.s32.totalorder %s1532_s8, %s1287_s13  ;;  %s1292_s17 = scalar_lea.hbm %s1699_s0, 128 }
  0x37   : > { %p1293_p1 = scmp.lt.s32.totalorder %s1532_s8, %s1699_s0  ;;  %p1294_p2 = scmp.lt.s32.totalorder %s1292_s17, %s1287_s13 }
  0x38   : > { %p1290_p5 = pnand %p1289_p0, %p1288_p13 }
  0x39   : > { %p1295_p6 = por %p1294_p2, %p1293_p1 }
  0x3a   : > { %p1291_p10 = pneg %p1290_p5 }
  0x3c   : > { %p1296_p12 = pnand %p1295_p6, %p1291_p10 }
  0x3e   : > { %1299 = shalt.err (!%p1296_p12)
}
  0x3f   : > { %s1300_s6 = scalar_lea.vmem %s220_s10, 64  ;;  %s1389_s28 = smov [#allocation4]  }
  0x40   : > { %p1301_p7 = scmp.ne.s32.totalorder %s220_s10, %s1300_s6  ;;  %s1305_s7 = sshll.u32 %s1389_s28, 4  ;;  %s1306_s7 = int_to_ptr.vmem [resolvable:$false] %s1305_s7 }
  0x41   : > { %s1307_s9 = scalar_lea.vmem %s1306_s7, 128  ;;  %p1308_p13 = scmp.lt.s32.totalorder %s220_s10, %s1306_s7 }
  0x42   : > { %p1303_p9 = pnand %p1301_p7, %p1289_p0  ;;  %p1309_p5 = scmp.lt.s32.totalorder %s1307_s9, %s1300_s6 }
  0x44   : > { %p1304_p3 = pneg %p1303_p9  ;;  %p1310_p4 = por %p1309_p5, %p1308_p13 }
  0x46   : > { %p1311_p8 = pnand %p1310_p4, %p1304_p3 }
  0x48   : > { %1314 = shalt.err (!%p1311_p8)
}
  0x49   : > { %1148 = dma.hbm_to_vmem [thread:$0]  (!%p1534_p11), %s1532_s8, 64, %s220_s10, %s209_s12  }
  0x4a   : > { %p1716_p10 = scmp.ne.s32.totalorder %s1711_s26, 0 }
  0x4b   : > { %s1555_s13 = sand.u32 (!%p1716_p10), 1, %s1375_s19   ;;  %p1717_p0 = scmp.ne.s32.totalorder (!%p1716_p10), %s1709_s24, 0 }
  0x4c   : > { %228 = sbr.rel (%p1716_p10) target bundleno = 1521 (0x5f1), region = 40  ;;  %s1006_s14 = sshll.u32 (!%p1716_p10), %s1555_s13, 2 }
  0x4d   : > { %s231_s16 = scalar_lea.sflag (!%p1716_p10), [#allocation5], %s1555_s13  ;;  %s234_s17 = scalar_lea.vmem (!%p1716_p10), [#allocation4], %s1006_s14 }
  0x51   : > { %1358 = dma.done.wait (%p1717_p0), %s231_s16, 64  }
  0x52   : > { %1360 = vsyncadd (%p1717_p0), %s231_s16, 4294967232  ;;  %p1718_p4 = scmp.eq.s32.totalorder %s1458_s22, 0 }
  0x54   : > { %1362 = dma.done.wait (%p1718_p4), [#allocation8], 512   ;;  %p1719_p8 = pmov %p1718_p4 }
  0x55   : > { %v1390_v0 = vmov 0.0   ;;  %vm1391_vm0 = vmmov 0   ;;  %v1211_v1 = vld [vmem:[#allocation7 + $0x8] sm:$0xff]   ;;  %v1212_v2 = vld [vmem:[#allocation7] sm:$0xff]   ;;  %v270_v3 = vld [vmem:[%s234_s17] sm:$0xf] }
  0x56   : > { %1364 = vsyncadd (%p1719_p8), [#allocation8], 4294966784  ;;  %1062 = vmatprep.subr.bf16.mxu0 %v1390_v0  ;;  %1066 = vmatprep.mubr.msk.bf16.mxu0 %vm1391_vm0, %v1390_v0  ;;  %vm294_vm1 = vcmask 261120   ;;  %v1010_v4 = vld [vmem:[%s1701_s2] ss:$0 sm:$0xff]  ;;  %vm339_vm2 = vcmask 781312  }
  0x57   : > { %1070 = vmatprep.subr.bf16.mxu1 %v1390_v0  ;;  %1072 = vmatprep.mubr.msk.bf16.mxu1 %vm1391_vm0, %v1390_v0  ;;  %s1392_s8 = smov 120   ;;  %s1393_s10 = smov 96   ;;  %vm347_vm3 = vcmask 64512   ;;  %vm411_vm4 = vcmask 1043456   ;;  %vm456_vm5 = vcmask 60416   ;;  %vm579_vm6 = vcmask 126016  }
  0x58   : > { %1063 = vmatpush3.bf16.msra.mxu0 %v1211_v1  ;;  %s1394_s11 = smov 80   ;;  %s1395_s12 = smov 88   ;;  %vm702_vm7 = vcmask 191616   ;;  %vm825_vm8 = vcmask 257216  }
  0x59   : > { %1064 = vmatprep.subr.bf16.mxu0 %v1390_v0  ;;  %s1396_s30 = smov 72   ;;  %s1397_s29 = smov 112  }
  0x5a   : > { %s1398_s6 = smov 104   ;;  %s1399_s28 = smov 56  }
  0x5b   : > { %s1400_s7 = smov 64   ;;  %s1401_s9 = smov 40  }
  0x5c   : > { %1065 = vmatpush3.bf16.msra.mxu0 %v1212_v2  ;;  %s1402_s14 = smov 48   ;;  %s1403_s16 = smov 8  }
  0x5d   : > { %1076 = vmatprep.subr.bf16.mxu0 %v1390_v0  ;;  %s1404_s17 = smov 16   ;;  %s1405_s24 = smov 24  }
  0x5e   : > { %s1009_s26 = sshll.u32 %s1555_s13, 3  ;;  %p1720_p11 = scmp.ne.s32.totalorder %s1714_s23, 0 }
  0x5f   : > { %1067 = vmatmul.mubr.msk.bf16.vlgmr.msra.gmra.mxu0 %vm294_vm1, %v270_v3 }
  0x60   : > { %1078 = vmatprep.mubr.msk.bf16.mxu0 %vm1391_vm0, %v1390_v0 }
 0x11f   : > { %v332_v5 = vpop.f32.mrf.mxu0 }
 0x120   : > { %v333_v6 = vadd.f32 %v1010_v4, %v332_v5 }
 0x121   : > { %v1068_v7 = vpop.f32.mrf.mxu0 }
 0x122   : > { %v338_v8 = vpack.c.bf16 %v333_v6, %v333_v6 }
 0x123   : > { %v335_v9 = vpop.f32.mrf.mxu0 }
 0x124   : > { %340 = vst.msk [vmem:[#allocation2] sm:$0xf] %vm339_vm2, %v338_v8 }
 0x125   : > { %v1069_v10 = vpop.f32.mrf.mxu0 }
 0x12b   : > { %v1581_v11 = vld [vmem:[#allocation2] ss:$0 sps:$4 sm:$0xff]  }
 0x12c   : > { %v341_v12 = vld [vmem:[#allocation2] sm:$0xf]  ;;  %462 = vrot.lane.b32.xlu1 %v1581_v11, %s1392_s8 }
 0x12d   : > { %v1583_v13 = vcombine.low %v341_v12, %v341_v12  ;;  %v1587_v14 = vld [vmem:[#allocation2] ss:$0 sps:$4 sm:$0xff]  }
 0x12e   : > { %v1591_v15 = vld [vmem:[#allocation2] ss:$0 sps:$4 sm:$0xff]  }
 0x12f   : > { %345 = vrot.lane.b32.xlu0 %v1583_v13, %s1393_s10 }
 0x130   : > { %587 = vrot.lane.b32.xlu1 %v1587_v14, %s1394_s11  ;;  %s1034_s11 = sshll.u32 %s1458_s22, 7 }
 0x133   : > { %464 = vrot.lane.b32.xlu0 %v1581_v11, %s1395_s12  ;;  %s268_s12 = scalar_lea.vmem [#allocation10], %s1009_s26 }
 0x134   : > { %710 = vrot.lane.b32.xlu1 %v1591_v15, %s1396_s30  ;;  %s909_s30 = sshll.u32 %s268_s12, 4  ;;  %s1657_s30 = int_to_ptr.vmem [resolvable:$true] %s909_s30 }
 0x135   : > { %s1315_s22 = scalar_lea.vmem %s1657_s30, 128 }
 0x136   : > { %p1316_p3 = scmp.ne.s32.totalorder %s1657_s30, %s1315_s22 }
 0x137   : > { %585 = vrot.lane.b32.xlu0 %v1587_v14, %s1397_s29 }
 0x138   : > { %p1317_p1 = pnand %p1316_p3, %p1720_p11 }
 0x13a   : > { %p1318_p2 = pneg %p1317_p1 }
 0x13b   : > { %708 = vrot.lane.b32.xlu0 %v1591_v15, %s1398_s6 }
 0x19e   : > { %v463_v19 = vpop.permute.xlu1 %462 }
 0x1a1   : > { %v346_v16 = vpop.permute.xlu0 %345 }
 0x1a2   : > { %v352_v17 = vsel %vm347_vm3, %v346_v16, 0  ;;  %v588_v21 = vpop.permute.xlu1 %587 }
 0x1a3   : > { %1071 = vmatpush3.bf16.xpose.msra.mxu1 %v352_v17  ;;  %v593_v22 = vsel %vm347_vm3, %v588_v21, 0 }
 0x1a4   : > { %1082 = vmatprep.subr.bf16.mxu1 %v1390_v0 }
 0x1a5   : > { %v465_v18 = vpop.permute.xlu0 %464 }
 0x1a6   : > { %v470_v20 = vsel %vm347_vm3, %v465_v18, 0  ;;  %v711_v23 = vpop.permute.xlu1 %710 }
 0x1a7   : > { %v716_v25 = vsel %vm347_vm3, %v711_v23, 0 }
 0x1a9   : > { %v586_v24 = vpop.permute.xlu0 %585 }
 0x1aa   : > { %1073 = vmatmul.mubr.msk.bf16.vlgmr.msra.gmra.mxu1 %vm347_vm3, %v341_v12 }
 0x1ab   : > { %1083 = vmatpush3.bf16.xpose.msra.mxu1 %v470_v20  ;;  %1084 = vmatprep.mubr.msk.bf16.mxu1 %vm1391_vm0, %v1390_v0 }
 0x1ac   : > { %1094 = vmatprep.subr.bf16.mxu1 %v1390_v0 }
 0x1ad   : > { %v709_v26 = vpop.permute.xlu0 %708 }
 0x1b2   : > { %1085 = vmatmul.mubr.msk.bf16.vlgmr.msra.gmra.mxu1 %vm347_vm3, %v463_v19 }
 0x1b3   : > { %1095 = vmatpush3.bf16.xpose.msra.mxu1 %v593_v22  ;;  %1096 = vmatprep.mubr.msk.bf16.mxu1 %vm1391_vm0, %v1390_v0 }
 0x1b4   : > { %1106 = vmatprep.subr.bf16.mxu1 %v1390_v0 }
 0x1ba   : > { %1097 = vmatmul.mubr.msk.bf16.vlgmr.msra.gmra.mxu1 %vm347_vm3, %v586_v24 }
 0x1bb   : > { %1107 = vmatpush3.bf16.xpose.msra.mxu1 %v716_v25  ;;  %1108 = vmatprep.mubr.msk.bf16.mxu1 %vm1391_vm0, %v1390_v0 }
 0x1bc   : > { %1118 = vmatprep.subr.bf16.mxu1 %v1390_v0 }
 0x1c2   : > { %1109 = vmatmul.mubr.msk.bf16.vlgmr.msra.gmra.mxu1 %vm347_vm3, %v709_v26 }
 0x1c3   : > { %1122 = vmatprep.mubr.msk.bf16.mxu1 %vm1391_vm0, %v1390_v0 }
 0x26a   : > { %v388_v27 = vpop.f32.mrf.mxu1 }
 0x26b   : > { %v394_v28 = vsel %vm347_vm3, %v388_v27, -inf }
 0x26c   : > { %395 = vmax.xlane.f32.xlu1 %v394_v28  ;;  %v1074_v29 = vpop.f32.mrf.mxu1 }
 0x26e   : > { %v391_v30 = vpop.f32.mrf.mxu1 }
 0x270   : > { %v1075_v31 = vpop.f32.mrf.mxu1 }
 0x272   : > { %v506_v32 = vpop.f32.mrf.mxu1 }
 0x273   : > { %v512_v33 = vsel %vm347_vm3, %v506_v32, -inf }
 0x274   : > { %513 = vmax.xlane.f32.xlu0 %v512_v33  ;;  %v1086_v34 = vpop.f32.mrf.mxu1 }
 0x276   : > { %v509_v35 = vpop.f32.mrf.mxu1 }
 0x278   : > { %v1087_v36 = vpop.f32.mrf.mxu1 }
 0x27a   : > { %v629_v37 = vpop.f32.mrf.mxu1 }
 0x27b   : > { %v635_v38 = vsel %vm347_vm3, %v629_v37, -inf }
 0x27c   : > { %636 = vmax.xlane.f32.xlu0 %v635_v38  ;;  %v1098_v39 = vpop.f32.mrf.mxu1 }
 0x27d   : > { %v1217_v39 = vld [vmem:[#allocation9 + $0x8] sm:$0xff]  }
 0x27e   : > { %v632_v40 = vpop.f32.mrf.mxu1  ;;  %1119 = vmatpush3.bf16.msra.mxu1 %v1217_v39 }
 0x27f   : > { %1120 = vmatprep.subr.bf16.mxu1 %v1390_v0 }
 0x280   : > { %v1099_v41 = vpop.f32.mrf.mxu1 }
 0x282   : > { %v752_v42 = vpop.f32.mrf.mxu1 }
 0x283   : > { %v758_v43 = vsel %vm347_vm3, %v752_v42, -inf }
 0x284   : > { %759 = vmax.xlane.f32.xlu1 %v758_v43  ;;  %v1110_v44 = vpop.f32.mrf.mxu1 }
 0x286   : > { %v755_v45 = vpop.f32.mrf.mxu1 }
 0x288   : > { %v1111_v46 = vpop.f32.mrf.mxu1 }
 0x2f5   : > { %v396_v47 = vpop.xlane.xlu1 %395 }
 0x2f6   : > { %v397_v48 = vsub.f32 %v388_v27, %v396_v47 }
 0x2f8   : > { %v398_v49 = vmul.f32 1.442695, %v397_v48 }
 0x2fa   : > { %1219 = vpow2.f32 %v398_v49 }
 0x2fd   : > { %v514_v50 = vpop.xlane.xlu0 %513 }
 0x2fe   : > { %v515_v51 = vsub.f32 %v506_v32, %v514_v50 }
 0x300   : > { %v516_v52 = vmul.f32 1.442695, %v515_v51 }
 0x302   : > { %1221 = vpow2.f32 %v516_v52 }
 0x305   : > { %v637_v53 = vpop.xlane.xlu0 %636 }
 0x306   : > { %v638_v54 = vsub.f32 %v629_v37, %v637_v53  ;;  %v1029_v53 = vld [vmem:[%s1703_s4] ss:$0 sm:$0xff] }
 0x307   : > { %v1220_v55 = vpop.eup %1219 }
 0x308   : > { %v639_v56 = vmul.f32 1.442695, %v638_v54  ;;  %v400_v57 = vsel %vm347_vm3, %v1220_v55, 0.0 }
 0x309   : > { %401 = vadd.xlane.f32.xlu0 %v400_v57 }
 0x30a   : > { %1223 = vpow2.f32 %v639_v56 }
 0x30d   : > { %v760_v62 = vpop.xlane.xlu1 %759 }
 0x30e   : > { %v761_v63 = vsub.f32 %v752_v42, %v760_v62  ;;  %v1218_v42 = vld [vmem:[#allocation9] sm:$0xff]  }
 0x30f   : > { %v1222_v58 = vpop.eup %1221  ;;  %1121 = vmatpush3.bf16.msra.mxu1 %v1218_v42 }
 0x310   : > { %v518_v59 = vsel %vm347_vm3, %v1222_v58, 0.0  ;;  %v762_v1 = vmul.f32 1.442695, %v761_v63 }
 0x311   : > { %519 = vadd.xlane.f32.xlu1 %v518_v59 }
 0x312   : > { %1225 = vpow2.f32 %v762_v1 }
 0x317   : > { %v1224_v60 = vpop.eup %1223 }
 0x318   : > { %v641_v61 = vsel %vm347_vm3, %v1224_v60, 0.0 }
 0x319   : > { %642 = vadd.xlane.f32.xlu0 %v641_v61 }
 0x31f   : > { %v1226_v2 = vpop.eup %1225 }
 0x320   : > { %v764_v3 = vsel %vm347_vm3, %v1226_v2, 0.0 }
 0x322   : > { %524 = vrot.lane.b32.xlu1 %v1581_v11, %s1399_s28  ;;  %s1655_s28 = scalar_lea.hbm %s1704_s5, %s1034_s11 }
 0x32f   : > { %406 = vrot.lane.b32.xlu0 %v1583_v13, %s1400_s7  ;;  %s896_s7 = scalar_lea.sflag [#allocation6], %s1555_s13 }
 0x333   : > { %770 = vrot.lane.b32.xlu0 %v1591_v15, %s1401_s9  ;;  %s1406_s9 = smov [#allocation10]  }
 0x346   : > { %765 = vadd.xlane.f32.xlu1 %v764_v3 }
 0x357   : > { %647 = vrot.lane.b32.xlu1 %v1587_v14, %s1402_s14  ;;  %s1319_s14 = sshll.u32 %s1406_s9, 4  ;;  %s1320_s14 = int_to_ptr.vmem [resolvable:$false] %s1319_s14 }
 0x358   : > { %p1322_p6 = scmp.lt.s32.totalorder %s1657_s30, %s1320_s14 }
 0x392   : > { %v402_v4 = vpop.xlane.xlu0 %401 }
 0x393   : > { %1227 = vrcp.f32 %v402_v4 }
 0x39a   : > { %v520_v5 = vpop.xlane.xlu1 %519 }
 0x39b   : > { %1229 = vrcp.f32 %v520_v5 }
 0x39e   : > { %v525_v11 = vpop.permute.xlu1 %524 }
 0x39f   : > { %v530_v15 = vsel %vm411_vm4, %v525_v11, 0 }
 0x3a0   : > { %v1228_v6 = vpop.eup %1227 }
 0x3a1   : > { %v404_v8 = vmul.f32 %v1228_v6, %v1220_v55 }
 0x3a2   : > { %v643_v7 = vpop.xlane.xlu0 %642 }
 0x3a3   : > { %v405_v12 = vpack.c.bf16 %v404_v8, %v404_v8  ;;  %1231 = vrcp.f32 %v643_v7 }
 0x3a6   : > { %v407_v9 = vpop.permute.xlu0 %406 }
 0x3a7   : > { %v413_v10 = vsel %vm411_vm4, %v407_v9, 0 }
 0x3a8   : > { %1077 = vmatpush3.bf16.msra.mxu0 %v413_v10  ;;  %v1230_v13 = vpop.eup %1229 }
 0x3a9   : > { %1088 = vmatprep.subr.bf16.mxu0 %v1390_v0  ;;  %v522_v14 = vmul.f32 %v1230_v13, %v1222_v58 }
 0x3aa   : > { %v771_v22 = vpop.permute.xlu0 %770 }
 0x3ab   : > { %1079 = vmatmul.mubr.msk.bf16.vlgmr.msra.gmra.mxu0 %vm347_vm3, %v405_v12  ;;  %v523_v16 = vpack.c.bf16 %v522_v14, %v522_v14  ;;  %v776_v24 = vsel %vm411_vm4, %v771_v22, 0 }
 0x3ac   : > { %1089 = vmatpush3.bf16.msra.mxu0 %v530_v15  ;;  %1090 = vmatprep.mubr.msk.bf16.mxu0 %vm1391_vm0, %v1390_v0 }
 0x3ad   : > { %1100 = vmatprep.subr.bf16.mxu0 %v1390_v0 }
 0x3b0   : > { %v1232_v17 = vpop.eup %1231 }
 0x3b1   : > { %v645_v19 = vmul.f32 %v1232_v17, %v1224_v60 }
 0x3b3   : > { %1091 = vmatmul.mubr.msk.bf16.vlgmr.msra.gmra.mxu0 %vm347_vm3, %v523_v16  ;;  %v646_v23 = vpack.c.bf16 %v645_v19, %v645_v19 }
 0x3b4   : > { %1102 = vmatprep.mubr.msk.bf16.mxu0 %vm1391_vm0, %v1390_v0 }
 0x3cf   : > { %v766_v18 = vpop.xlane.xlu1 %765 }
 0x3d0   : > { %1233 = vrcp.f32 %v766_v18 }
 0x3d3   : > { %v648_v20 = vpop.permute.xlu1 %647 }
 0x3d4   : > { %v653_v21 = vsel %vm411_vm4, %v648_v20, 0 }
 0x3d5   : > { %1101 = vmatpush3.bf16.msra.mxu0 %v653_v21 }
 0x3d6   : > { %1112 = vmatprep.subr.bf16.mxu0 %v1390_v0 }
 0x3d8   : > { %1103 = vmatmul.mubr.msk.bf16.vlgmr.msra.gmra.mxu0 %vm347_vm3, %v646_v23 }
 0x3d9   : > { %1113 = vmatpush3.bf16.msra.mxu0 %v776_v24  ;;  %1114 = vmatprep.mubr.msk.bf16.mxu0 %vm1391_vm0, %v1390_v0 }
 0x3dd   : > { %v1234_v25 = vpop.eup %1233 }
 0x3de   : > { %v768_v26 = vmul.f32 %v1234_v25, %v1226_v2 }
 0x3e0   : > { %v769_v27 = vpack.c.bf16 %v768_v26, %v768_v26 }
 0x3e2   : > { %1115 = vmatmul.mubr.msk.bf16.vlgmr.msra.gmra.mxu0 %vm347_vm3, %v769_v27 }
 0x46b   : > { %v449_v28 = vpop.f32.mrf.mxu0 }
 0x46c   : > { %v455_v29 = vpack.c.bf16 %v449_v28, %v449_v28 }
 0x46d   : > { %v1080_v30 = vpop.f32.mrf.mxu0 }
 0x46e   : > { %457 = vst.msk [vmem:[#allocation3] sm:$0xf] %vm456_vm5, %v455_v29 }
 0x46f   : > { %v452_v31 = vpop.f32.mrf.mxu0 }
 0x471   : > { %v1081_v32 = vpop.f32.mrf.mxu0 }
 0x473   : > { %v566_v33 = vpop.f32.mrf.mxu0 }
 0x474   : > { %v1037_v34 = vpack.c.bf16 %v566_v33, %v566_v33 }
 0x475   : > { %v1092_v35 = vpop.f32.mrf.mxu0 }
 0x476   : > { %576 = vrot.lane.b32.xlu1 %v1037_v34, %s1403_s16  ;;  %s1321_s16 = scalar_lea.vmem %s1320_s14, 256 }
 0x477   : > { %v569_v36 = vpop.f32.mrf.mxu0  ;;  %p1323_p12 = scmp.lt.s32.totalorder %s1321_s16, %s1315_s22 }
 0x479   : > { %v1093_v37 = vpop.f32.mrf.mxu0  ;;  %p1324_p7 = por %p1323_p12, %p1322_p6 }
 0x47b   : > { %p1325_p9 = pnand %p1324_p7, %p1318_p2 }
 0x498   : > { %v689_v38 = vpop.f32.mrf.mxu0 }
 0x499   : > { %v1038_v40 = vpack.c.bf16 %v689_v38, %v689_v38 }
 0x49a   : > { %v1104_v41 = vpop.f32.mrf.mxu0 }
 0x49b   : > { %699 = vrot.lane.b32.xlu0 %v1038_v40, %s1404_s17 }
 0x49c   : > { %v692_v43 = vpop.f32.mrf.mxu0 }
 0x49e   : > { %v1105_v44 = vpop.f32.mrf.mxu0 }
 0x4a2   : > { %v812_v45 = vpop.f32.mrf.mxu0 }
 0x4a3   : > { %v1039_v46 = vpack.c.bf16 %v812_v45, %v812_v45 }
 0x4a4   : > { %v1116_v47 = vpop.f32.mrf.mxu0 }
 0x4a5   : > { %822 = vrot.lane.b32.xlu1 %v1039_v46, %s1405_s24 }
 0x4a6   : > { %v815_v48 = vpop.f32.mrf.mxu0 }
 0x4a8   : > { %v1117_v49 = vpop.f32.mrf.mxu0 }
 0x4e8   : > { %v577_v50 = vpop.permute.xlu1 %576 }
 0x4e9   : > { %580 = vst.msk [vmem:[#allocation3] sm:$0xf] %vm579_vm6, %v577_v50 }
 0x50d   : > { %v700_v51 = vpop.permute.xlu0 %699 }
 0x50e   : > { %703 = vst.msk [vmem:[#allocation3] sm:$0xf] %vm702_vm7, %v700_v51 }
 0x517   : > { %v823_v0 = vpop.permute.xlu1 %822 }
 0x518   : > { %826 = vst.msk [vmem:[#allocation3] sm:$0xf] %vm825_vm8, %v823_v0 }
 0x51f   : > { %v827_v52 = vld [vmem:[#allocation3] sm:$0xf] }
 0x520   : > { %1123 = vmatmul.mubr.msk.bf16.vlgmr.msra.gmra.mxu1 %vm294_vm1, %v827_v52 }
 0x5e0   : > { %v888_v54 = vpop.f32.mrf.mxu1 }
 0x5e1   : > { %v889_v55 = vadd.f32 %v1029_v53, %v888_v54 }
 0x5e2   : > { %v1124_v56 = vpop.f32.mrf.mxu1 }
 0x5e3   : > { %894 = vst.msk [vmem:[%s268_s12] sm:$0xff] %vm294_vm1, %v889_v55 }
 0x5e4   : > { %v891_v57 = vpop.f32.mrf.mxu1 }
 0x5e5   : > { %1328 = shalt.err (!%p1325_p9)
}
 0x5e6   : > { %s1329_s17 = scalar_lea.hbm %s1655_s28, 128  ;;  %s1333_s26 = scalar_lea.hbm %s1704_s5, 256 }
 0x5e7   : > { %p1330_p13 = scmp.ne.s32.totalorder %s1655_s28, %s1329_s17  ;;  %p1334_p0 = scmp.lt.s32.totalorder %s1655_s28, %s1704_s5 }
 0x5e8   : > { %p1335_p4 = scmp.lt.s32.totalorder %s1333_s26, %s1329_s17 }
 0x5e9   : > { %p1331_p5 = pnand %p1330_p13, %p1720_p11 }
 0x5ea   : > { %p1336_p8 = por %p1335_p4, %p1334_p0 }
 0x5eb   : > { %p1332_p10 = pneg %p1331_p5 }
 0x5ed   : > { %p1337_p3 = pnand %p1336_p8, %p1332_p10 }
 0x5ef   : > { %1340 = shalt.err (!%p1337_p3)
}
 0x5f0   : > { %1136 = dma.vmem_to_hbm [thread:$0]  (%p1720_p11), %s1657_s30, 128, %s1655_s28, %s896_s7   ;;  %v1125_v58 = vpop.f32.mrf.mxu1 }
 0x5f1 PF: > { %s921_s11 = sand.u32 1, %s1371_s18   ;;  %p1721_p1 = scmp.ne.s32.totalorder %s1710_s25, 0 }
 0x5f2   : > { %p1722_p2 = scmp.ge.s32.totalorder %s1383_s21, 2  ;;  %s922_s12 = scalar_lea.sflag [#allocation6], %s921_s11 }
 0x5f4   : > { %p1150_p6 = pnand %p1722_p2, %p1721_p1 }
 0x5f6   : > { %p1151_p12 = pneg %p1150_p6 }
 0x5f8   : > { %1366 = dma.done.wait (%p1151_p12), %s922_s12, 128  }
 0x5f9   : > { %1368 = vsyncadd (%p1151_p12), %s922_s12, 4294967168  ;;  %p19_p7 = scmp.ge.s32.totalorder %s1509_s15, 4   ;;  %s1723_s18 = smov %s1375_s19 }
 0x5fa   : > { %s1724_s19 = smov %s1379_s20  ;;  %s1725_s20 = smov %s1525_s27 }
 0x5fb   : > { %s1726_s21 = smov %s1509_s15  ;;  %21 = sbr.rel (!%p19_p7) target bundleno = 6 (0x6), region = 93 }
 0x600   :  { %927 = vsyncpa [#allocation5], 1 }
 0x601   :  { %929 = vsyncpa [#allocation5 + $0x1], 1 }
 0x602   :  { %930 = vsyncpa [#allocation8], 1 }
 0x603   :  { %931 = vsyncpa [#allocation6], 1 }
 0x604   :  { %933 = vsyncpa [#allocation6 + $0x1], 1 }

</bundles_post_ra>
